<compile_context>
chip_gen: v5e
topology: v5e:2x2
jax: 0.10.0
libtpu: 0.0.40
codegen_flags: <defaults>
</compile_context>

<pallas_src>
import functools
import numpy as np
import jax
import jax.numpy as jnp
from jax.experimental import pallas as pl
from jax.experimental.pallas import tpu as pltpu

_SQRT2 = float(np.sqrt(2.0))

_VMEM_LIMIT_BYTES = 32 * 1024 * 1024    # scoped VMEM limit (safe on v5e/v6e/v7x)
_VMEM_BUDGET_BYTES = 26 * 1024 * 1024   # design budget (headroom under the limit)
_W_TILE_BUDGET_BYTES = 8 * 1024 * 1024  # one weight tile (x2 when double-buffered)


def _round_up(x, m):
    return ((x + m - 1) // m) * m


def _apply_activation(y, activation):
    if activation == 'linear':
        return y
    if activation == 'lrelu':
        return jnp.where(y >= 0.0, y, 0.2 * y) * _SQRT2
    if activation == 'relu':
        return jnp.maximum(y, 0.0) * _SQRT2
    # TODO(synk): other bias_act activations (tanh/sigmoid/swish/...) not wired up.
    raise NotImplementedError(activation)


def _fc_single_kernel(*refs, activation, has_bias):
    """Single K step: full-K x tile @ full-K weight panel, epilogue straight to output."""
    if has_bias:
        x_ref, w_ref, b_ref, o_ref = refs
    else:
        x_ref, w_ref, o_ref = refs
        b_ref = None
    y = jnp.dot(x_ref[...], w_ref[...], preferred_element_type=jnp.float32)
    if has_bias:
        y = y + b_ref[...]                       # (1, tn) f32, bias_gain pre-folded
    o_ref[...] = _apply_activation(y, activation).astype(o_ref.dtype)


def _fc_ktile_kernel(*refs, activation, has_bias):
    """Fallback for very large in_features: K-tiled reduction with an f32 accumulator."""
    if has_bias:
        x_ref, w_ref, b_ref, o_ref, acc_ref = refs
    else:
        x_ref, w_ref, o_ref, acc_ref = refs
        b_ref = None

    k = pl.program_id(2)

    @pl.when(k == 0)
    def _():
        acc_ref[...] = jnp.zeros_like(acc_ref)

    acc_ref[...] += jnp.dot(x_ref[...], w_ref[...], preferred_element_type=jnp.float32)

    @pl.when(k == pl.num_programs(2) - 1)
    def _():
        y = acc_ref[...]
        if has_bias:
            y = y + b_ref[...]
        o_ref[...] = _apply_activation(y, activation).astype(o_ref.dtype)


def _largest_tn(n_pad, k_rows, itemsize):
    """Largest multiple-of-128 divisor of n_pad whose [k_rows, tn] weight tile fits budget."""
    units = n_pad // 128
    for m in range(units, 0, -1):
        if units % m == 0 and (128 * m) * k_rows * itemsize <= _W_TILE_BUDGET_BYTES:
            return 128 * m
    return 128


def _pick_tm(M, per_row_bytes, budget_bytes):
    cap = max(8, (max(budget_bytes, 0) // max(per_row_bytes, 1)) // 8 * 8)
    cap = min(cap, 512)
    if M <= cap:
        if M <= 16:
            return M                       # single block; block dim == array dim is legal
        half = _round_up((M + 1) // 2, 8)  # >= 2 M blocks -> both v7x TensorCores get work
        return half if half <= cap else cap
    return cap


class FullyConnectedLayer:
    """JAX/Pallas re-implementation of the PyTorch FullyConnectedLayer forward."""

    def __init__(self, in_features, out_features, activation='linear', bias=True,
                 lr_multiplier=1.0, weight_init=1.0, bias_init=0.0, *, key):
        self.in_features = in_features
        self.out_features = out_features
        self.activation = activation
        # torch.randn([out, in]) * (weight_init / lr_multiplier)
        self.weight = (jax.random.normal(key, (out_features, in_features), dtype=jnp.float32)
                       * (weight_init / lr_multiplier))
        if bias:
            b0 = np.broadcast_to(np.asarray(bias_init, dtype=np.float32), [out_features])
            self.bias = jnp.asarray(b0 / lr_multiplier, dtype=jnp.float32)
        else:
            self.bias = None
        self.weight_gain = float(lr_multiplier / np.sqrt(in_features))
        self.bias_gain = float(lr_multiplier)

        # ---- one-time kernel-side layout decisions (f32 itemsize = conservative) ----
        K, N = in_features, out_features
        self._N_pad = N_pad = _round_up(N, 128)

        if K * 128 * 4 <= _W_TILE_BUDGET_BYTES:
            # A full-K weight panel fits VMEM: single K step, no accumulator scratch.
            self._plan = 'single'
            self._tk = K
            self._K_pad = K
            self._tn = _largest_tn(N_pad, K, 4)
        else:
            # Very large in_features: fall back to K-tiled accumulation.
            self._plan = 'ktile'
            self._tk = 2048 if K > 2048 else 512
            self._K_pad = _round_up(K, self._tk)
            self._tn = _largest_tn(N_pad, self._tk, 4)

        # Weight: gain folded in, pre-transposed to [K, N], zero-padded -- done ONCE.
        w_kn = jnp.transpose(self.weight) * self.weight_gain
        w_kn = jnp.pad(w_kn, ((0, self._K_pad - K), (0, N_pad - N)))
        self._w_cache = {jnp.dtype(jnp.float32): w_kn}   # per-dtype cast cache

        # Bias with bias_gain folded in, as a (1, N_pad) f32 row (added in f32 epilogue).
        if self.bias is not None:
            b = (self.bias * self.bias_gain).astype(jnp.float32)
            self._b_row = jnp.pad(b, (0, N_pad - N)).reshape(1, N_pad)
        else:
            self._b_row = None

    def _weight_for(self, dtype):
        dt = jnp.dtype(dtype)
        w = self._w_cache.get(dt)
        if w is None:
            w = self._w_cache[jnp.dtype(jnp.float32)].astype(dt)
            self._w_cache[dt] = w
        return w

    def __call__(self, x):
        M, K = x.shape
        assert K == self.in_features
        N, N_pad = self.out_features, self._N_pad
        K_pad, tk, tn = self._K_pad, self._tk, self._tn
        dt = jnp.dtype(x.dtype)
        itemsize = dt.itemsize

        w = self._weight_for(dt)              # cached cast: no per-call weight copy
        has_bias = self._b_row is not None
        bias_bytes = 2 * tn * 4 if has_bias else 0
        w_buf_bytes = 2 * tk * tn * itemsize  # double-buffered weight panel

        if self._plan == 'single':
            per_row = 2 * (tk + tn) * itemsize               # db x row + db out row
            tm = _pick_tm(M, per_row, _VMEM_BUDGET_BYTES - w_buf_bytes - bias_bytes)
            nj, ni = N_pad // tn, pl.cdiv(M, tm)

            kernel = functools.partial(_fc_single_kernel,
                                       activation=self.activation, has_bias=has_bias)
            in_specs = [
                pl.BlockSpec((tm, tk), lambda j, i: (i, 0)),   # x: full-K row block
                pl.BlockSpec((tk, tn), lambda j, i: (0, j)),   # weight: constant over i
            ]
            operands = [x, w]
            if has_bias:
                in_specs.append(pl.BlockSpec((1, tn), lambda j, i: (0, j)))
                operands.append(self._b_row)

            out = pl.pallas_call(
                kernel,
                out_shape=jax.ShapeDtypeStruct((M, N_pad), x.dtype),
                grid_spec=pltpu.PrefetchScalarGridSpec(
                    num_scalar_prefetch=0,
                    grid=(nj, ni),                              # N panels outer, M inner
                    in_specs=in_specs,
                    out_specs=pl.BlockSpec((tm, tn), lambda j, i: (i, j)),
                ),
                compiler_params=pltpu.CompilerParams(
                    dimension_semantics=("parallel", "parallel"),
                    vmem_limit_bytes=_VMEM_LIMIT_BYTES,
                ),
            )(*operands)
        else:
            # K-tiled fallback: pad x along K only (zero x cols meet zero weight rows).
            xp = x if K_pad == K else jnp.pad(x, ((0, 0), (0, K_pad - K)))
            per_row = 2 * (tk + tn) * itemsize + tn * 4        # + f32 accumulator row
            tm = _pick_tm(M, per_row, _VMEM_BUDGET_BYTES - w_buf_bytes - bias_bytes)
            ni, nj, nk = pl.cdiv(M, tm), N_pad // tn, K_pad // tk

            kernel = functools.partial(_fc_ktile_kernel,
                                       activation=self.activation, has_bias=has_bias)
            in_specs = [
                pl.BlockSpec((tm, tk), lambda i, j, k: (i, k)),
                pl.BlockSpec((tk, tn), lambda i, j, k: (k, j)),
            ]
            operands = [xp, w]
            if has_bias:
                in_specs.append(pl.BlockSpec((1, tn), lambda i, j, k: (0, j)))
                operands.append(self._b_row)

            out = pl.pallas_call(
                kernel,
                out_shape=jax.ShapeDtypeStruct((M, N_pad), x.dtype),
                grid_spec=pltpu.PrefetchScalarGridSpec(
                    num_scalar_prefetch=0,
                    grid=(ni, nj, nk),
                    in_specs=in_specs,
                    out_specs=pl.BlockSpec((tm, tn), lambda i, j, k: (i, j)),
                    scratch_shapes=[pltpu.VMEM((tm, tn), jnp.float32)],
                ),
                compiler_params=pltpu.CompilerParams(
                    dimension_semantics=("parallel", "parallel", "arbitrary"),
                    vmem_limit_bytes=_VMEM_LIMIT_BYTES,
                ),
            )(*operands)

        return out if N_pad == N else out[:, :N]


def _reference(layer: FullyConnectedLayer, x):
    w = layer.weight.astype(x.dtype) * layer.weight_gain
    y = x @ w.T
    if layer.bias is not None:
        y = y + (layer.bias * layer.bias_gain).astype(x.dtype)[None, :]
    if layer.activation == 'lrelu':
        y = jnp.where(y >= 0, y, 0.2 * y) * _SQRT2
    elif layer.activation == 'relu':
        y = jnp.maximum(y, 0.0) * _SQRT2
    return y


if __name__ == "__main__":
    key = jax.random.PRNGKey(0)
    k1, k2, k3, k4, k5, kx1, kx2, kx3, kx4 = jax.random.split(key, 9)

    # 1) linear + bias (the torch addmm path), tiny mapping-network-like shape.
    batch, in_f, out_f = 8, 32, 64
    layer_lin = FullyConnectedLayer(in_f, out_f, activation='linear', bias=True,
                                    lr_multiplier=0.01, bias_init=1.0, key=k1)
    x = jax.random.normal(kx1, (batch, in_f), dtype=jnp.float32)
    y = layer_lin(x)
    jax.block_until_ready(y)
    np.testing.assert_allclose(np.asarray(y), np.asarray(_reference(layer_lin, x)),
                               rtol=1e-5, atol=1e-5)

    # 2) lrelu + bias (the bias_act path), same tiny shape.
    layer_act = FullyConnectedLayer(in_f, out_f, activation='lrelu', bias=True, key=k2)
    y2 = layer_act(x)
    jax.block_until_ready(y2)
    np.testing.assert_allclose(np.asarray(y2), np.asarray(_reference(layer_act, x)),
                               rtol=1e-5, atol=1e-5)

    # 3) resident-weight plan with N padding, M split into 2 blocks (edge M block).
    layer_big = FullyConnectedLayer(1536, 192, activation='lrelu', bias=True, key=k3)
    x3 = jax.random.normal(kx2, (40, 1536), dtype=jnp.float32)
    y3 = layer_big(x3)
    jax.block_until_ready(y3)
    np.testing.assert_allclose(np.asarray(y3), np.asarray(_reference(layer_big, x3)),
                               rtol=3e-5, atol=3e-5)

    # 4) no-bias + linear, M not a multiple of 8 (single full-M block).
    layer_nb = FullyConnectedLayer(48, 96, activation='linear', bias=False, key=k4)
    x4 = jax.random.normal(kx3, (10, 48), dtype=jnp.float32)
    y4 = layer_nb(x4)
    jax.block_until_ready(y4)
    np.testing.assert_allclose(np.asarray(y4), np.asarray(_reference(layer_nb, x4)),
                               rtol=1e-5, atol=1e-5)

    # 5) exercise the K-tiled fallback on a small shape by shrinking the weight budget
    #    during construction (restored right after).
    _saved_budget = _W_TILE_BUDGET_BYTES
    _W_TILE_BUDGET_BYTES = 64 * 1024
    layer_kt = FullyConnectedLayer(768, 96, activation='lrelu', bias=True, key=k5)
    _W_TILE_BUDGET_BYTES = _saved_budget
    assert layer_kt._plan == 'ktile'
    x5 = jax.random.normal(kx4, (24, 768), dtype=jnp.float32)
    y5 = layer_kt(x5)
    jax.block_until_ready(y5)
    np.testing.assert_allclose(np.asarray(y5), np.asarray(_reference(layer_kt, x5)),
                               rtol=3e-5, atol=3e-5)

    print("KERNEL_OK")
</pallas_src>

<mosaic_0001>
module attributes {stable_mosaic.version = 11 : i64} {
  func.func @_fc_single_kernel(%arg0: i32, %arg1: i32, %arg2: memref<8x32xf32, #tpu.memory_space<vmem>>, %arg3: memref<32x128xf32, #tpu.memory_space<vmem>>, %arg4: memref<1x128xf32, #tpu.memory_space<vmem>>, %arg5: memref<8x128xf32, #tpu.memory_space<vmem>>) attributes {dimension_semantics = [#tpu.dimension_semantics<parallel>, #tpu.dimension_semantics<parallel>], iteration_bounds = array<i64: 1, 1>, scalar_prefetch = 0 : i64, scratch_operands = 0 : i64, tpu.core_type = #tpu.core_type<tc>, window_params = [{transform_indices = @transform_0, window_bounds = array<i64: 8, 32>}, {transform_indices = @transform_1, window_bounds = array<i64: 32, 128>}, {transform_indices = @transform_2, window_bounds = array<i64: 1, 128>}, {transform_indices = @transform_3, window_bounds = array<i64: 8, 128>}]} {
    %c0 = arith.constant 0 : index
    %c0_0 = arith.constant 0 : index
    %0 = vector.load %arg2[%c0, %c0_0] : memref<8x32xf32, #tpu.memory_space<vmem>>, vector<8x32xf32>
    %c0_1 = arith.constant 0 : index
    %c0_2 = arith.constant 0 : index
    %1 = vector.load %arg3[%c0_1, %c0_2] : memref<32x128xf32, #tpu.memory_space<vmem>>, vector<32x128xf32>
    %cst = arith.constant dense<0.000000e+00> : vector<8x128xf32>
    %2 = tpu.matmul %0, %1, %cst {dimension_numbers = #tpu.dot_dimension_numbers<[1], [0], [0], [1], [0, 0, 1, 1], [], []>} : vector<8x32xf32>, vector<32x128xf32>, vector<8x128xf32> -> vector<8x128xf32>
    %c0_3 = arith.constant 0 : index
    %c0_4 = arith.constant 0 : index
    %3 = vector.load %arg4[%c0_3, %c0_4] : memref<1x128xf32, #tpu.memory_space<vmem>>, vector<1x128xf32>
    %4 = vector.broadcast %3 : vector<1x128xf32> to vector<8x128xf32>
    %5 = arith.addf %2, %4 : vector<8x128xf32>
    %c0_5 = arith.constant 0 : index
    %c0_6 = arith.constant 0 : index
    %6 = vector.load %arg5[%c0_5, %c0_6] : memref<8x128xf32, #tpu.memory_space<vmem>>, vector<8x128xf32>
    tpu.vector_store %arg5[%c0_5, %c0_6], %5 {strides = array<i32>} : memref<8x128xf32, #tpu.memory_space<vmem>>, vector<8x128xf32>,
    return
  }
  func.func @transform_0(%arg0: i32, %arg1: i32) -> (i32, i32) {
    %c0_i32 = arith.constant 0 : i32
    %c0_i32_0 = arith.constant 0 : i32
    return %arg1, %c0_i32 : i32, i32
  }
  func.func @transform_1(%arg0: i32, %arg1: i32) -> (i32, i32) {
    %c0_i32 = arith.constant 0 : i32
    %c0_i32_0 = arith.constant 0 : i32
    return %c0_i32, %arg0 : i32, i32
  }
  func.func @transform_2(%arg0: i32, %arg1: i32) -> (i32, i32) {
    %c0_i32 = arith.constant 0 : i32
    %c0_i32_0 = arith.constant 0 : i32
    return %c0_i32, %arg0 : i32, i32
  }
  func.func @transform_3(%arg0: i32, %arg1: i32) -> (i32, i32) {
    %c0_i32 = arith.constant 0 : i32
    return %arg1, %arg0 : i32, i32
  }
}

</mosaic_0001>

<bundles_post_ra>
// kernel: tpu_custom_call.1
= control target key start
LH: loop header
LB: loop body
LE: loop exit
PB: predicated region body
PF: predicated region fallthrough
CT: control target
= control target key end

     0   :  { %8 = vsyncpa [#allocation3], 0  ;;  %s219_s0 = inlined_call_operand.hbm [shape: f32[8,32], index: 0, kind: input, shape index: {}]   ;;  %s220_s1 = inlined_call_operand.hbm [shape: f32[32,128], index: 1, kind: input, shape index: {}]   ;;  %s221_s2 = inlined_call_operand.vmem [shape: f32[1,128], index: 2, kind: input, shape index: {}]   ;;  %s222_s3 = inlined_call_operand.hbm [shape: f32[8,128], index: 3, kind: output, shape index: {}]  }
   0x1   :  { %9 = vsyncpa [#allocation6], 0 }
   0x2   :  { %10 = vsyncpa [#allocation4], 0  ;;  %s16_s14 = sshll.u32 %s219_s0, 4  ;;  %s182_s15 = smov [#allocation2]   ;;  %s17_s14 = int_to_ptr.hbm [resolvable:$true] %s16_s14 }
   0x3   :  { %s18_s16 = sshll.u32 %s182_s15, 4  ;;  %s26_s19 = sshll.u32 %s220_s1, 4  ;;  %s19_s16 = int_to_ptr.vmem [resolvable:$true] %s18_s16  ;;  %s27_s19 = int_to_ptr.hbm [resolvable:$true] %s26_s19 }
   0x4   :  { %21 = dma.hbm_to_vmem [thread:$0]  %s17_s14, 128, %s19_s16, [#allocation3]  }
   0x5   :  { %s183_s20 = smov [#allocation5]   ;;  %s184_s22 = smov 128  }
   0x6   :  { %s28_s21 = sshll.u32 %s183_s20, 4  ;;  %s185_s23 = smov 8   ;;  %s29_s21 = int_to_ptr.vmem [resolvable:$true] %s28_s21 }
   0x7   :  { %34 = dma.hbm_to_vmem [thread:$0]  %s27_s19, 512, %s29_s21, [#allocation6], %s184_s22, %s184_s22, %s185_s23  }
   0x8   :  { %176 = dma.done.wait [#allocation3], 128  }
   0x9   :  { %177 = vsyncadd [#allocation3], 4294967168 }
   0xa   :  { %178 = dma.done.wait [#allocation6], 512  }
   0xb   :  { %179 = vsyncadd [#allocation6], 4294966784  ;;  %v49_v0 = vld [vmem:[#allocation5 + $0x18] sm:$0xff]  ;;  %v48_v1 = vld [vmem:[#allocation5 + $0x10] sm:$0xff]  ;;  %vm54_vm0 = vcmask 261120   ;;  %s186_s24 = smov [#allocation7]  }
   0xc   :  { %70 = vmatpush.msra.mxu0 %v49_v0  ;;  %v47_v2 = vld [vmem:[#allocation5 + $0x8] sm:$0xff]  ;;  %v46_v3 = vld [vmem:[#allocation5] sm:$0xff]  ;;  %v45_v4 = vld [vmem:[#allocation2] sm:$0xff]  ;;  %s84_s25 = sshll.u32 %s186_s24, 4  ;;  %s86_s28 = sshll.u32 %s222_s3, 4  ;;  %s85_s25 = int_to_ptr.vmem [resolvable:$true] %s84_s25  ;;  %s87_s28 = int_to_ptr.hbm [resolvable:$true] %s86_s28 }
   0xd   :  { %v103_v5 = vld [vmem:[%s221_s2] ss:$0 sm:$0xff] }
   0xe   :  { %71 = vmatpush.msra.mxu0 %v48_v1 }
  0x10   :  { %72 = vmatpush.msra.mxu0 %v47_v2 }
  0x12   :  { %73 = vmatpush.msra.mxu0 %v46_v3 }
  0x13   :  { %97 = vmatmul.msk.f32.vlgmr.msra.gmra.mxu0 %vm54_vm0, %v45_v4 }
  0x90   :  { %v75_v6 = vpop.f32.mrf.mxu0 }
  0x91   :  { %v76_v7 = vadd.f32 %v103_v5, %v75_v6 }
  0x93   :  { %78 = vst [vmem:[#allocation7] sm:$0xff] %v76_v7 }
  0x94   :  { %89 = dma.vmem_to_hbm [thread:$0]  %s85_s25, 128, %s87_s28, [#allocation4]  }
  0x95   :  { %180 = dma.done.wait [#allocation4], 128  }
  0x96   :  { %181 = vsyncadd [#allocation4], 4294967168 }
  0x97   :  { %94 = vsyncpa [#allocation3], 1 }
  0x98   :  { %95 = vsyncpa [#allocation6], 1 }
  0x99   :  { %96 = vsyncpa [#allocation4], 1 }

</bundles_post_ra>
